<compile_context>
chip_gen: v7x
topology: tpu7x:2x2x1
jax: 0.10.0
libtpu: 0.0.40
codegen_flags: <defaults>
</compile_context>

<pallas_src>
import math

import jax
import jax.numpy as jnp
from jax.experimental import pallas as pl
from jax.experimental.pallas import tpu as pltpu


def _round_up(x, m):
    return (x + m - 1) // m * m


def _mlp_fused_kernel(dec_ref, wc_ref, b1_ref, w2_ref, b2_ref, out_ref):
    """dec_ref:(TB, L*D)  wc_ref:(L*D, H)  b1_ref:(1, H)  w2_ref:(1, H)
    b2_ref:(1, 1) in SMEM  out_ref:(1, TB) lane-dense."""
    # Fused Linear(d_model, 1) + Linear(L, H): one MXU matmul, K = L*D.
    h = jnp.dot(dec_ref[...], wc_ref[...], preferred_element_type=jnp.float32)
    h = jnp.maximum(h + b1_ref[...], 0.0)                      # (TB, H)  ReLU
    # Linear(H, 1): N=1 is a pathological MXU shape -> VPU mul + XLU lane reduce.
    o = jnp.sum(h * w2_ref[...], axis=-1)                      # (TB,)
    o = jax.nn.sigmoid(o + b2_ref[0, 0])                       # scalar bias from SMEM
    out_ref[...] = o[None, :].astype(out_ref.dtype)            # lane-dense (1, TB)


def _choose_batch_tile(B, LD):
    """Pick batch tile TB so 2x double-buffered input tiles stay well under the
    smallest scoped-VMEM limits (16 MiB default on v5e, 64 MiB physical v7x)."""
    row_bytes = LD * 4                        # one f32 batch row of dec_out
    budget = 6 << 20                          # per input buffer (x2 double-buffer)
    tb = max(1, min(budget // max(row_bytes, 1), 512))
    b8 = _round_up(B, 8)
    if tb >= b8:
        tb = b8                               # one tile covers the whole (padded) batch
    elif tb >= 128:
        tb = (tb // 128) * 128                # lane/MXU-friendly multiple
    else:
        tb = max(8, (tb // 8) * 8)            # keep full f32 sublane groups
    return tb, _round_up(B, tb)


def mlp_forward(dec_out, params):
    """dec_out: (B, input_dim, d_model) f32 -> (B,) f32 (0-d scalar if B == 1)."""
    B, L, D = dec_out.shape
    LD = L * D
    w_lin, b_lin = params["w_lin"], params["b_lin"]    # (D, 1), (1, 1)
    w1, b1 = params["w1"], params["b1"]                # (L, H), (1, H)
    w2, b2 = params["w2"], params["b2"]                # (H, 1), (1, 1)
    H = w1.shape[1]

    # --- fuse Linear(D,1) into Linear(L,H) (wrapper-side precompute) ---
    wc = (w1[:, None, :] * w_lin[None, :, 0:1]).reshape(LD, H)        # (L*D, H)
    b1f = b1 + b_lin[0, 0] * jnp.sum(w1, axis=0, keepdims=True)       # (1, H)
    w2_row = w2.T                                                     # (1, H)

    tb, bp = _choose_batch_tile(B, LD)
    grid = bp // tb

    # (B, L, D) -> (B, L*D) is a free contiguous leading-dim merge; pad batch.
    dec2d = dec_out.reshape(B, LD)
    if bp != B:
        dec2d = jnp.pad(dec2d, ((0, bp - B), (0, 0)))

    # Explicit VMEM budget: double-buffered input + weights + output + slack.
    vmem_need = (2 * tb * LD + 2 * LD * H + 4 * H + 2 * tb) * 4
    vmem_limit = int(min(48 << 20, max(vmem_need + (2 << 20), 16 << 20)))

    out = pl.pallas_call(
        _mlp_fused_kernel,
        out_shape=jax.ShapeDtypeStruct((grid, tb), jnp.float32),
        grid=(grid,),
        in_specs=[
            pl.BlockSpec((tb, LD), lambda i: (i, 0)),                 # dec tile
            pl.BlockSpec((LD, H), lambda i: (0, 0)),                  # fused weight
            pl.BlockSpec((1, H), lambda i: (0, 0)),                   # fused bias
            pl.BlockSpec((1, H), lambda i: (0, 0)),                   # w2 row
            pl.BlockSpec(memory_space=pltpu.MemorySpace.SMEM),        # b2 scalar
        ],
        out_specs=pl.BlockSpec((1, tb), lambda i: (i, 0)),            # lane-dense
        compiler_params=pltpu.CompilerParams(
            dimension_semantics=("parallel",),
            vmem_limit_bytes=vmem_limit),
    )(dec2d, wc, b1f, w2_row, b2)

    out = out.reshape(bp)[:B]
    # torch .squeeze(): 0-d scalar when B == 1, else shape (B,).
    return out[0] if B == 1 else out


def init_params(key, d_model, input_dim, mlp_hidden_dim):
    """Deterministic torch-nn.Linear-style uniform init (weights stored [in, out])."""
    ks = jax.random.split(key, 6)

    def lin(kw, kb, fan_in, fan_out):
        bound = 1.0 / math.sqrt(fan_in)
        w = jax.random.uniform(kw, (fan_in, fan_out), jnp.float32, -bound, bound)
        b = jax.random.uniform(kb, (1, fan_out), jnp.float32, -bound, bound)
        return w, b

    w_lin, b_lin = lin(ks[0], ks[1], d_model, 1)            # self.linear
    w1, b1 = lin(ks[2], ks[3], input_dim, mlp_hidden_dim)   # mlp[0]
    w2, b2 = lin(ks[4], ks[5], mlp_hidden_dim, 1)           # mlp[2]
    return {"w_lin": w_lin, "b_lin": b_lin,
            "w1": w1, "b1": b1, "w2": w2, "b2": b2}


if __name__ == "__main__":
    B, input_dim, d_model, mlp_hidden_dim = 2, 8, 32, 32

    key = jax.random.PRNGKey(0)
    k_x, k_p = jax.random.split(key)
    dec_out = jax.random.normal(k_x, (B, input_dim, d_model), jnp.float32)
    params = init_params(k_p, d_model, input_dim, mlp_hidden_dim)

    out = jax.block_until_ready(mlp_forward(dec_out, params))

    # Pure-JAX reference of the ORIGINAL (unfused) forward for sanity.
    ref = dec_out @ params["w_lin"]                 # (B, L, 1)
    ref = ref[..., 0] + params["b_lin"][0, 0]       # (B, L)
    ref = jnp.maximum(ref @ params["w1"] + params["b1"], 0.0)
    ref = jax.nn.sigmoid(ref @ params["w2"] + params["b2"])[:, 0]

    assert out.shape == (B,), out.shape
    assert jnp.allclose(out, ref, atol=1e-5, rtol=1e-5), (out, ref)

    print("KERNEL_OK")
</pallas_src>

<mosaic_0001>
module attributes {stable_mosaic.version = 11 : i64} {
  func.func @_mlp_fused_kernel(%arg0: i32, %arg1: memref<8x256xf32, #tpu.memory_space<vmem>>, %arg2: memref<256x32xf32, #tpu.memory_space<vmem>>, %arg3: memref<1x32xf32, #tpu.memory_space<vmem>>, %arg4: memref<1x32xf32, #tpu.memory_space<vmem>>, %arg5: memref<1x1xf32, #tpu.memory_space<smem>>, %arg6: memref<1x8xf32, #tpu.memory_space<vmem>>) attributes {dimension_semantics = [#tpu.dimension_semantics<parallel>], iteration_bounds = array<i64: 1>, scalar_prefetch = 0 : i64, scratch_operands = 0 : i64, tpu.core_type = #tpu.core_type<tc>, window_params = [{transform_indices = @transform_0, window_bounds = array<i64: 8, 256>}, {pipeline_mode = #tpu.pipeline_mode<synchronous>, transform_indices = @transform_1, window_bounds = array<i64: 256, 32>}, {pipeline_mode = #tpu.pipeline_mode<synchronous>, transform_indices = @transform_2, window_bounds = array<i64: 1, 32>}, {pipeline_mode = #tpu.pipeline_mode<synchronous>, transform_indices = @transform_3, window_bounds = array<i64: 1, 32>}, {transform_indices = @transform_4, window_bounds = array<i64: 1, 1>}, {transform_indices = @transform_5, window_bounds = array<i64: 1, 8>}]} {
    %c0 = arith.constant 0 : index
    %c0_0 = arith.constant 0 : index
    %0 = vector.load %arg1[%c0, %c0_0] : memref<8x256xf32, #tpu.memory_space<vmem>>, vector<8x256xf32>
    %c0_1 = arith.constant 0 : index
    %c0_2 = arith.constant 0 : index
    %1 = vector.load %arg2[%c0_1, %c0_2] : memref<256x32xf32, #tpu.memory_space<vmem>>, vector<256x32xf32>
    %cst = arith.constant dense<0.000000e+00> : vector<8x32xf32>
    %2 = tpu.matmul %0, %1, %cst {dimension_numbers = #tpu.dot_dimension_numbers<[1], [0], [0], [1], [0, 0, 1, 1], [], []>} : vector<8x256xf32>, vector<256x32xf32>, vector<8x32xf32> -> vector<8x32xf32>
    %c0_3 = arith.constant 0 : index
    %c0_4 = arith.constant 0 : index
    %3 = vector.load %arg3[%c0_3, %c0_4] : memref<1x32xf32, #tpu.memory_space<vmem>>, vector<1x32xf32>
    %4 = vector.broadcast %3 : vector<1x32xf32> to vector<8x32xf32>
    %5 = arith.addf %2, %4 : vector<8x32xf32>
    %cst_5 = arith.constant 0.000000e+00 : f32
    %6 = vector.broadcast %cst_5 : f32 to vector<8x32xf32>
    %7 = arith.maximumf %5, %6 : vector<8x32xf32>
    %c0_6 = arith.constant 0 : index
    %c0_7 = arith.constant 0 : index
    %8 = vector.load %arg4[%c0_6, %c0_7] : memref<1x32xf32, #tpu.memory_space<vmem>>, vector<1x32xf32>
    %9 = vector.broadcast %8 : vector<1x32xf32> to vector<8x32xf32>
    %10 = arith.mulf %7, %9 : vector<8x32xf32>
    %cst_8 = arith.constant dense<0.000000e+00> : vector<8xf32>
    %11 = vector.multi_reduction <add>, %10, %cst_8 [1] : vector<8x32xf32> to vector<8xf32>
    %c0_9 = arith.constant 0 : index
    %c0_10 = arith.constant 0 : index
    %12 = memref.load %arg5[%c0_9, %c0_10] : memref<1x1xf32, #tpu.memory_space<smem>>
    %13 = vector.broadcast %12 : f32 to vector<8xf32>
    %14 = arith.addf %11, %13 : vector<8xf32>
    %15 = arith.negf %14 : vector<8xf32>
    %16 = math.exp %15 : vector<8xf32>
    %cst_11 = arith.constant 1.000000e+00 : f32
    %17 = vector.broadcast %cst_11 : f32 to vector<8xf32>
    %18 = arith.addf %17, %16 : vector<8xf32>
    %19 = arith.divf %17, %18 : vector<8xf32>
    %20 = vector.shape_cast %19 : vector<8xf32> to vector<1x8xf32>
    %c0_12 = arith.constant 0 : index
    %c0_13 = arith.constant 0 : index
    %21 = vector.load %arg6[%c0_12, %c0_13] : memref<1x8xf32, #tpu.memory_space<vmem>>, vector<1x8xf32>
    tpu.vector_store %arg6[%c0_12, %c0_13], %20 {strides = array<i32>} : memref<1x8xf32, #tpu.memory_space<vmem>>, vector<1x8xf32>,
    return
  }
  func.func @transform_0(%arg0: i32) -> (i32, i32) {
    %c0_i32 = arith.constant 0 : i32
    %c0_i32_0 = arith.constant 0 : i32
    return %arg0, %c0_i32 : i32, i32
  }
  func.func @transform_1(%arg0: i32) -> (i32, i32) {
    %c0_i32 = arith.constant 0 : i32
    %c0_i32_0 = arith.constant 0 : i32
    %c0_i32_1 = arith.constant 0 : i32
    return %c0_i32, %c0_i32_0 : i32, i32
  }
  func.func @transform_2(%arg0: i32) -> (i32, i32) {
    %c0_i32 = arith.constant 0 : i32
    %c0_i32_0 = arith.constant 0 : i32
    %c0_i32_1 = arith.constant 0 : i32
    return %c0_i32, %c0_i32_0 : i32, i32
  }
  func.func @transform_3(%arg0: i32) -> (i32, i32) {
    %c0_i32 = arith.constant 0 : i32
    %c0_i32_0 = arith.constant 0 : i32
    %c0_i32_1 = arith.constant 0 : i32
    return %c0_i32, %c0_i32_0 : i32, i32
  }
  func.func @transform_4(%arg0: i32) -> (i32, i32) {
    %c0_i32 = arith.constant 0 : i32
    %c0_i32_0 = arith.constant 0 : i32
    %c0_i32_1 = arith.constant 0 : i32
    return %c0_i32, %c0_i32_0 : i32, i32
  }
  func.func @transform_5(%arg0: i32) -> (i32, i32) {
    %c0_i32 = arith.constant 0 : i32
    %c0_i32_0 = arith.constant 0 : i32
    return %arg0, %c0_i32 : i32, i32
  }
}

</mosaic_0001>

<bundles_post_ra>
// kernel: tpu_custom_call.1
= control target key start
LH: loop header
LB: loop body
LE: loop exit
PB: predicated region body
PF: predicated region fallthrough
CT: control target
= control target key end

     0   :  { %s432_s0 = inlined_call_operand.vmem [shape: f32[8,256], index: 0, kind: input, shape index: {}]   ;;  %s433_s1 = inlined_call_operand.vmem [shape: f32[256,32], index: 1, kind: input, shape index: {}]   ;;  %s434_s2 = inlined_call_operand.vmem [shape: f32[1,32], index: 2, kind: input, shape index: {}]   ;;  %s435_s3 = inlined_call_operand.vmem [shape: f32[1,32], index: 3, kind: input, shape index: {}]   ;;  %s436_s4 = inlined_call_operand.<no memory space> [shape: f32[1,1], index: 4, kind: input, shape index: {}]   ;;  %s437_s5 = inlined_call_operand.hbm [shape: f32[1,8], index: 5, kind: output, shape index: {}]  }
   0x1   :  { %v40_v0 = vld [vmem:[%s433_s1 + $0x80] sm:$0xff]  ;;  %v41_v1 = vld [vmem:[%s433_s1 + $0x88] sm:$0xff]  ;;  %v42_v5 = vld [vmem:[%s433_s1 + $0x90] sm:$0xff] }
   0x2   :  { %v24_v2 = vld [vmem:[%s433_s1] sm:$0xff]  ;;  %v217_v3 = vpack.c.bf16 %v41_v1, %v40_v0  ;;  %v25_v4 = vld [vmem:[%s433_s1 + $0x8] sm:$0xff]  ;;  %v43_v6 = vld [vmem:[%s433_s1 + $0x98] sm:$0xff] }
   0x3   :  { %v219_v7 = vpack.c.bf16 %v25_v4, %v24_v2  ;;  %v221_v8 = vpack.c.bf16 %v43_v6, %v42_v5  ;;  %v26_v9 = vld [vmem:[%s433_s1 + $0x10] sm:$0xff]  ;;  %v27_v10 = vld [vmem:[%s433_s1 + $0x18] sm:$0xff]  ;;  %v44_v11 = vld [vmem:[%s433_s1 + $0xa0] sm:$0xff] }
   0x4   :  { %218 = vmatprep.subr.bf16.mxu0 %v217_v3  ;;  %v45_v12 = vld [vmem:[%s433_s1 + $0xa8] sm:$0xff]  ;;  %v223_v13 = vpack.c.bf16 %v27_v10, %v26_v9  ;;  %v28_v15 = vld [vmem:[%s433_s1 + $0x20] sm:$0xff]  ;;  %v46_v17 = vld [vmem:[%s433_s1 + $0xb0] sm:$0xff] }
   0x5   :  { %220 = vmatpush3.bf16.msra.mxu0 %v219_v7  ;;  %v225_v14 = vpack.c.bf16 %v45_v12, %v44_v11  ;;  %v29_v16 = vld [vmem:[%s433_s1 + $0x28] sm:$0xff]  ;;  %v47_v18 = vld [vmem:[%s433_s1 + $0xb8] sm:$0xff]  ;;  %v30_v21 = vld [vmem:[%s433_s1 + $0x30] sm:$0xff] }
   0x6   :  { %222 = vmatprep.subr.bf16.mxu0 %v221_v8  ;;  %v227_v19 = vpack.c.bf16 %v29_v16, %v28_v15  ;;  %v229_v20 = vpack.c.bf16 %v47_v18, %v46_v17  ;;  %v31_v22 = vld [vmem:[%s433_s1 + $0x38] sm:$0xff]  ;;  %v48_v23 = vld [vmem:[%s433_s1 + $0xc0] sm:$0xff]  ;;  %v49_v24 = vld [vmem:[%s433_s1 + $0xc8] sm:$0xff] }
   0x7   :  { %v23_v25 = vld [vmem:[%s432_s0 + $0x8] sm:$0xff] }
   0x8   :  { %127 = vmatprep.mubr.f32.mxu0 %v23_v25 }
   0x9   :  { %224 = vmatpush3.bf16.msra.mxu0 %v223_v13 }
   0xa   :  { %226 = vmatprep.subr.bf16.mxu0 %v225_v14 }
   0xb   :  { %11 = vsyncpa [#allocation4], 0  ;;  %v231_v26 = vpack.c.bf16 %v31_v22, %v30_v21  ;;  %v233_v27 = vpack.c.bf16 %v49_v24, %v48_v23  ;;  %v32_v28 = vld [vmem:[%s433_s1 + $0x40] sm:$0xff]  ;;  %v33_v29 = vld [vmem:[%s433_s1 + $0x48] sm:$0xff]  ;;  %vm142_vm0 = vcmask 261120   ;;  %v147_v59 = vstv %s436_s4 }
   0xc   :  { %v50_v30 = vld [vmem:[%s433_s1 + $0xd0] sm:$0xff]  ;;  %v51_v31 = vld [vmem:[%s433_s1 + $0xd8] sm:$0xff]  ;;  %v235_v32 = vpack.c.bf16 %v33_v29, %v32_v28  ;;  %v52_v36 = vld [vmem:[%s433_s1 + $0xe0] sm:$0xff]  ;;  %v156_v1 = vlaneseq  ;;  %vm163_vm1 = vcmask 57344  }
   0xd   :  { %228 = vmatpush3.bf16.msra.mxu0 %v227_v19  ;;  %v237_v33 = vpack.c.bf16 %v51_v31, %v50_v30  ;;  %v34_v34 = vld [vmem:[%s433_s1 + $0x50] sm:$0xff]  ;;  %v35_v35 = vld [vmem:[%s433_s1 + $0x58] sm:$0xff]  ;;  %v53_v37 = vld [vmem:[%s433_s1 + $0xe8] sm:$0xff] }
   0xe   :  { %230 = vmatprep.subr.bf16.mxu0 %v229_v20  ;;  %v239_v38 = vpack.c.bf16 %v35_v35, %v34_v34  ;;  %v241_v39 = vpack.c.bf16 %v53_v37, %v52_v36  ;;  %v36_v40 = vld [vmem:[%s433_s1 + $0x60] sm:$0xff]  ;;  %v37_v41 = vld [vmem:[%s433_s1 + $0x68] sm:$0xff]  ;;  %v54_v42 = vld [vmem:[%s433_s1 + $0xf0] sm:$0xff]  ;;  %v157_v2 = vand.u32 127, %v156_v1  ;;  %v159_v3 = vshrl.u32 %v156_v1, 7 }
   0xf   :  { %v55_v43 = vld [vmem:[%s433_s1 + $0xf8] sm:$0xff]  ;;  %v243_v44 = vpack.c.bf16 %v37_v41, %v36_v40  ;;  %v38_v46 = vld [vmem:[%s433_s1 + $0x70] sm:$0xff]  ;;  %v22_v49 = vld [vmem:[%s432_s0] sm:$0xff] }
  0x10   :  { %v245_v45 = vpack.c.bf16 %v55_v43, %v54_v42  ;;  %v39_v47 = vld [vmem:[%s433_s1 + $0x78] sm:$0xff]  ;;  %v179_v51 = vld [vmem:[%s434_s2] ss:$0 sm:$0xff]  ;;  %v160_v4 = vsub.s32 %v157_v2, %v159_v3  ;;  %s278_s2 = smov [#allocation3]  }
  0x11   :  { %232 = vmatpush3.bf16.msra.mxu0 %v231_v26  ;;  %v247_v48 = vpack.c.bf16 %v39_v47, %v38_v46  ;;  %v180_v55 = vld [vmem:[%s435_s3] ss:$0 sm:$0xff]  ;;  %s171_s3 = sshll.u32 %s278_s2, 4  ;;  %s172_s3 = int_to_ptr.vmem [resolvable:$true] %s171_s3 }
  0x12   :  { %234 = vmatprep.subr.bf16.mxu0 %v233_v27  ;;  %s254_s15 = scalar_lea.vmem %s172_s3, 16  ;;  %s258_s4 = scalar_lea.vmem %s172_s3, 32 }
  0x13   :  { %p255_p0 = scmp.ne.s32.totalorder %s172_s3, %s254_s15  ;;  %p259_p1 = scmp.lt.s32.totalorder %s172_s3, %s172_s3 }
  0x14   :  { %p260_p2 = scmp.lt.s32.totalorder %s258_s4, %s254_s15 }
  0x15   :  { %236 = vmatpush3.bf16.msra.mxu0 %v235_v32 }
  0x16   :  { %238 = vmatprep.subr.bf16.mxu0 %v237_v33  ;;  %p261_p3 = por %p260_p2, %p259_p1 }
  0x18   :  { %p262_p4 = pnand %p261_p3, %p255_p0 }
  0x19   :  { %240 = vmatpush3.bf16.msra.mxu0 %v239_v38 }
  0x1a   :  { %242 = vmatprep.subr.bf16.mxu0 %v241_v39 }
  0x1d   :  { %244 = vmatpush3.bf16.msra.mxu0 %v243_v44 }
  0x1e   :  { %246 = vmatprep.subr.bf16.mxu0 %v245_v45 }
  0x21   :  { %248 = vmatpush3.bf16.msra.mxu0 %v247_v48 }
  0x24   :  { %128 = vmatmul.mubr.f32.vlgmr.msra.gmra.mrb[0].mxu0 %v22_v49 }
  0xf7   :  { %v214_v50 = vpop.f32.mrb[0].mxu0 }
  0xf8   :  { %v215_v52 = vpop.f32.mrb[1].mxu0 }
  0xf9   :  { %v216_v53 = vadd.f32 %v215_v52, %v214_v50 }
  0xfb   :  { %v130_v54 = vadd.f32 %v216_v53, %v179_v51 }
  0xfd   :  { %v133_v56 = vmax.f32 %v130_v54, 0.0 }
  0xff   :  { %v141_v57 = vmul.f32 %v180_v55, %v133_v56 }
 0x101   :  { %v143_v58 = vsel %vm142_vm0, %v141_v57, 0.0 }
 0x102   :  { %144 = vadd.xlane.f32.xlu0 %v143_v58 }
 0x18f   :  { %v145_v60 = vpop.xlane.xlu0 %144 }
 0x190   :  { %v148_v61 = vadd.f32 %v147_v59, %v145_v60 }
 0x192   :  { %v181_v62 = vmul.f32 -1.442695, %v148_v61 }
 0x194   :  { %250 = vpow2.f32 %v181_v62 }
 0x19e   :  { %v251_v63 = vpop.eup %250 }
 0x19f   :  { %v152_v0 = vadd.f32 1.0, %v251_v63 }
 0x1a1   :  { %252 = vrcp.f32 %v152_v0 }
 0x1ab   :  { %v253_v5 = vpop.eup %252 }
 0x1ac   :  { %v161_v6 = vrot.slane %v253_v5, %v160_v4 }
 0x1ae   :  { %164 = vst.msk [vmem:[#allocation3] sm:$0x1] %vm163_vm1, %v161_v6 }
 0x1af   :  { %265 = shalt.err (!%p262_p4)
}
 0x1b0   :  { %s266_s18 = scalar_lea.hbm %s437_s5, 16 }
 0x1b1   :  { %p267_p5 = scmp.ne.s32.totalorder %s437_s5, %s266_s18  ;;  %p270_p6 = scmp.lt.u32.totalorder %s266_s18, %s437_s5 }
 0x1b3   :  { %p272_p7 = pnand %p270_p6, %p267_p5 }
 0x1b5   :  { %275 = shalt.err (!%p272_p7)
}
 0x1b6   :  { %174 = dma.vmem_to_hbm [thread:$0]  %s172_s3, 16, %s437_s5, [#allocation4]  }
 0x1b7   :  { %276 = dma.done.wait [#allocation4], 16  }
 0x1b8   :  { %277 = vsyncadd [#allocation4], 4294967280 }
 0x1b9   :  { %178 = vsyncpa [#allocation4], 1 }

</bundles_post_ra>
